<compile_context>
chip_gen: v6e
topology: v6e:2x2x1
jax: 0.10.0
libtpu: 0.0.40
codegen_flags: <defaults>
</compile_context>

<pallas_src>
import functools

import jax
import jax.numpy as jnp
from jax.experimental import pallas as pl
from jax.experimental.pallas import tpu as pltpu


def _encoder_layer_kernel(x_ref, w1t_ref, w2t_ref, ln_ref, out_ref, attn_ref, *,
                          d_model, eps=1e-5, mxu_dtype=jnp.bfloat16):
    """One grid step: G fused (batch, node) slabs, each [T, Dp] (Dp = padded d_model)."""
    G, T, Dp = x_ref.shape
    scale = 1.0 / (float(d_model) ** 0.5)

    xf = x_ref[...].astype(jnp.float32)          # residual / statistics path (f32)
    xm = xf.astype(mxu_dtype)                    # single MXU operand copy (q == k == v)

    # ---- self attention over time, batched over the G slabs ----------------------
    # Padded channels are zero, so they add nothing to the scores; 1/sqrt(d_model) is
    # applied once to the f32 scores (no separate scaled-q temporary).
    scores = jnp.einsum('gtd,gsd->gts', xm, xm,
                        preferred_element_type=jnp.float32) * scale     # [G, T, T]
    m = jnp.max(scores, axis=-1, keepdims=True)
    e = jnp.exp(scores - m)
    # Exact reciprocal over the tiny [G, T, 1] denominators -> attn rows sum to 1.
    attn = e * (1.0 / jnp.sum(e, axis=-1, keepdims=True))
    new_x = jnp.einsum('gts,gsd->gtd', attn.astype(mxu_dtype), xm,
                       preferred_element_type=jnp.float32)              # [G, T, Dp]

    # ---- padding-aware LayerNorm (true-D divisors, masked variance) ---------------
    if Dp != d_model:
        lane_mask = jax.lax.broadcasted_iota(jnp.int32, (1, Dp), 1) < d_model
    else:
        lane_mask = None

    def layer_norm(v, gamma, beta):
        mu = jnp.sum(v, axis=-1, keepdims=True) * (1.0 / d_model)
        diff = v - mu
        if lane_mask is not None:
            diff = jnp.where(lane_mask, diff, 0.0)     # padded channels contribute 0
        var = jnp.sum(diff * diff, axis=-1, keepdims=True) * (1.0 / d_model)
        return diff * jax.lax.rsqrt(var + eps) * gamma + beta

    g1 = ln_ref[0:1, :]
    b1 = ln_ref[1:2, :]
    g2 = ln_ref[2:3, :]
    b2 = ln_ref[3:4, :]

    # ---- residual + LayerNorm1 on a tall flattened [G*T, Dp] slab -----------------
    xr = (xf + new_x).reshape(G * T, Dp)          # dropout == identity (eval mode)
    xn = layer_norm(xr, g1, b1)

    # ---- FFN: 1x1 conv -> relu -> 1x1 conv == two tall MXU matmuls ----------------
    h = jnp.dot(xn.astype(mxu_dtype), w1t_ref[...],
                preferred_element_type=jnp.float32)                     # [G*T, d_ffp]
    h = jnp.maximum(h, 0.0)
    y = jnp.dot(h.astype(mxu_dtype), w2t_ref[...],
                preferred_element_type=jnp.float32)                     # [G*T, Dp]

    # ---- residual + LayerNorm2 ------------------------------------------------------
    zn = layer_norm(xn + y, g2, b2)

    out_ref[...] = zn.reshape(G, T, Dp).astype(out_ref.dtype)
    attn_ref[...] = attn.astype(attn_ref.dtype)


def _round_up(v, m):
    return ((v + m - 1) // m) * m


def _vmem_budget_bytes(frac=0.75):
    """~75% of physical VMEM (≈48 MiB v7x, ≈96 MiB v5e/v6e); conservative fallback."""
    cap = 64 << 20                      # safe on every generation if the query fails
    try:
        info = pltpu.get_tpu_info()
        c = getattr(info, "vmem_capacity_bytes", None)
        if c:
            cap = int(c)
    except Exception:
        pass
    return int(cap * frac)


def _choose_group(bn, t, per_row_bytes, fixed_bytes, budget_bytes,
                  min_steps=4, max_rows=2048):
    """How many (batch, node) slabs G to fuse per grid step (G divides bn)."""
    if t % 8 != 0:
        return 1                        # keep the (G,T,D)->(G*T,D) collapse sublane-aligned
    avail = max(0, budget_bytes - fixed_bytes)
    # 1.5x margin on the per-row estimate (it is not a compiled VMEM report).
    g_vmem = max(1, int(avail // max(1, (per_row_bytes * t * 3) // 2)))
    g_cap = min(g_vmem, max(1, max_rows // t), bn)
    divs = [g for g in range(1, bn + 1) if bn % g == 0]
    # Prefer >= min_steps grid steps (>=2 per TensorCore on v7x megacore), then >=2, then 1.
    for steps in (min_steps, 2, 1):
        cands = [g for g in divs if g <= g_cap and bn // g >= steps]
        if cands:
            return max(cands)
    return 1


def encoder_layer(x, w1, w2, g1, b1, g2, b2, *,
                  mxu_dtype=jnp.bfloat16, attn_dtype=jnp.bfloat16, eps=1e-5):
    """x: [B, N, T, D]; w1: [d_ff, D] (conv1 weight squeezed); w2: [D, d_ff]."""
    B, N, T, D = x.shape
    d_ff = w1.shape[0]
    BN = B * N

    # ---- channel padding to lane width (only when needed) --------------------------
    Dp = _round_up(D, 128)
    d_ffp = _round_up(d_ff, 128)

    xf = x.reshape(BN, T, D)
    if Dp != D:
        xf = jnp.pad(xf, ((0, 0), (0, 0), (0, Dp - D)))

    w1t = jnp.asarray(w1, jnp.float32).T                  # [D, d_ff]
    w2t = jnp.asarray(w2, jnp.float32).T                  # [d_ff, D]
    if Dp != D or d_ffp != d_ff:
        w1t = jnp.pad(w1t, ((0, Dp - D), (0, d_ffp - d_ff)))
        w2t = jnp.pad(w2t, ((0, d_ffp - d_ff), (0, Dp - D)))
    w1t = w1t.astype(mxu_dtype)
    w2t = w2t.astype(mxu_dtype)

    ln = jnp.stack([g1, b1, g2, b2]).astype(jnp.float32)  # [4, D]
    if Dp != D:
        ln = jnp.pad(ln, ((0, 0), (0, Dp - D)))           # zero gamma/beta on padded lanes

    # ---- generation-aware VMEM budget + group-size selection ------------------------
    budget = _vmem_budget_bytes()
    x_sz = xf.dtype.itemsize
    out_sz = jnp.dtype(x.dtype).itemsize
    w_sz = jnp.dtype(mxu_dtype).itemsize
    a_sz = jnp.dtype(attn_dtype).itemsize
    f32 = 4
    per_row_bytes = (f32 * (6 * Dp + d_ffp + 3 * T)       # f32 temporaries per fused row
                     + w_sz * (2 * Dp + d_ffp + T)        # bf16 casts (xm, xn, h, attn)
                     + 2 * Dp * (x_sz + out_sz)           # double-buffered x / out blocks
                     + 2 * T * a_sz)                      # double-buffered attn block
    fixed_bytes = 2 * (2 * Dp * d_ffp * w_sz + 4 * Dp * f32)   # weights + LN params (x2 bufs)
    G = _choose_group(BN, T, per_row_bytes, fixed_bytes, budget)
    grid = (BN // G,)

    out, attn = pl.pallas_call(
        functools.partial(_encoder_layer_kernel,
                          d_model=D, eps=eps, mxu_dtype=mxu_dtype),
        out_shape=(jax.ShapeDtypeStruct((BN, T, Dp), x.dtype),
                   jax.ShapeDtypeStruct((BN, T, T), attn_dtype)),
        grid=grid,
        in_specs=[
            pl.BlockSpec((G, T, Dp), lambda i: (i, 0, 0)),     # G fused x slabs
            pl.BlockSpec((Dp, d_ffp), lambda i: (0, 0)),       # W1^T (constant block)
            pl.BlockSpec((d_ffp, Dp), lambda i: (0, 0)),       # W2^T (constant block)
            pl.BlockSpec((4, Dp), lambda i: (0, 0)),           # [gamma1; beta1; gamma2; beta2]
        ],
        out_specs=(pl.BlockSpec((G, T, Dp), lambda i: (i, 0, 0)),
                   pl.BlockSpec((G, T, T), lambda i: (i, 0, 0))),
        compiler_params=pltpu.CompilerParams(
            dimension_semantics=("parallel",),
            vmem_limit_bytes=budget),
    )(xf, w1t, w2t, ln)

    out = out.reshape(B, N, T, Dp)[..., :D]
    attn = attn.reshape(B, N, T, T)
    return out, attn


def _reference(x, w1, w2, g1, b1, g2, b2, eps=1e-5):
    D = x.shape[-1]
    scores = jnp.einsum('bntd,bnsd->bnts', x, x) / jnp.sqrt(jnp.float32(D))
    a = jax.nn.softmax(scores, axis=-1)
    new_x = jnp.einsum('bnts,bnsd->bntd', a, x)
    xr = x + new_x

    def ln(v, g, b):
        mu = v.mean(-1, keepdims=True)
        var = ((v - mu) ** 2).mean(-1, keepdims=True)
        return (v - mu) / jnp.sqrt(var + eps) * g + b

    xn = ln(xr, g1, b1)
    h = jnp.maximum(jnp.einsum('bntd,fd->bntf', xn, w1), 0.0)
    y = jnp.einsum('bntf,df->bntd', h, w2)
    return ln(xn + y, g2, b2), a


if __name__ == "__main__":
    B, N, T, D = 2, 4, 8, 32
    d_ff = 4 * D

    key = jax.random.PRNGKey(0)
    kx, k1, k2 = jax.random.split(key, 3)
    x = jax.random.normal(kx, (B, N, T, D), dtype=jnp.float32)
    # conv1.weight: [d_ff, D, 1, 1] -> squeezed to [d_ff, D]; conv2: [D, d_ff]
    w1 = jax.random.normal(k1, (d_ff, D), dtype=jnp.float32) * (1.0 / D ** 0.5)
    w2 = jax.random.normal(k2, (D, d_ff), dtype=jnp.float32) * (1.0 / d_ff ** 0.5)
    # LayerNorm params: PyTorch default init (ones / zeros)
    g1 = jnp.ones((D,), jnp.float32)
    b1 = jnp.zeros((D,), jnp.float32)
    g2 = jnp.ones((D,), jnp.float32)
    b2 = jnp.zeros((D,), jnp.float32)

    out, attn = encoder_layer(x, w1, w2, g1, b1, g2, b2)
    jax.block_until_ready((out, attn))

    out_ref, attn_ref = _reference(x, w1, w2, g1, b1, g2, b2)
    # bf16 MXU operands (and bf16 attn storage) introduce ~1e-2-level error vs. the
    # pure-f32 reference; an f32 build (mxu_dtype=jnp.float32) matches to ~1e-3.
    assert jnp.allclose(attn.astype(jnp.float32), attn_ref, rtol=2e-2, atol=2e-2), "attn mismatch"
    assert jnp.allclose(out.astype(jnp.float32), out_ref, rtol=5e-2, atol=5e-2), "output mismatch"

    print("KERNEL_OK")
</pallas_src>

<mosaic_0001>
module attributes {stable_mosaic.version = 11 : i64} {
  func.func @_encoder_layer_kernel(%arg0: i32, %arg1: memref<2x8x128xf32, #tpu.memory_space<vmem>>, %arg2: memref<128x128xbf16, #tpu.memory_space<vmem>>, %arg3: memref<128x128xbf16, #tpu.memory_space<vmem>>, %arg4: memref<4x128xf32, #tpu.memory_space<vmem>>, %arg5: memref<2x8x128xf32, #tpu.memory_space<vmem>>, %arg6: memref<2x8x8xbf16, #tpu.memory_space<vmem>>) attributes {dimension_semantics = [#tpu.dimension_semantics<parallel>], iteration_bounds = array<i64: 4>, scalar_prefetch = 0 : i64, scratch_operands = 0 : i64, tpu.core_type = #tpu.core_type<tc>, window_params = [{transform_indices = @transform_0, window_bounds = array<i64: 2, 8, 128>}, {pipeline_mode = #tpu.pipeline_mode<synchronous>, transform_indices = @transform_1, window_bounds = array<i64: 128, 128>}, {pipeline_mode = #tpu.pipeline_mode<synchronous>, transform_indices = @transform_2, window_bounds = array<i64: 128, 128>}, {pipeline_mode = #tpu.pipeline_mode<synchronous>, transform_indices = @transform_3, window_bounds = array<i64: 4, 128>}, {transform_indices = @transform_4, window_bounds = array<i64: 2, 8, 128>}, {transform_indices = @transform_5, window_bounds = array<i64: 2, 8, 8>}]} {
    %c0 = arith.constant 0 : index
    %c0_0 = arith.constant 0 : index
    %c0_1 = arith.constant 0 : index
    %0 = vector.load %arg1[%c0, %c0_0, %c0_1] : memref<2x8x128xf32, #tpu.memory_space<vmem>>, vector<2x8x128xf32>
    %1 = arith.truncf %0 : vector<2x8x128xf32> to vector<2x8x128xbf16>
    "tpu.trace_start"() <{level = 10 : i32, message = "gtd,gsd->gts"}> : () -> ()
    %cst = arith.constant dense<0.000000e+00> : vector<2x8x8xf32>
    %2 = tpu.matmul %1, %1, %cst {dimension_numbers = #tpu.dot_dimension_numbers<[2], [2], [1], [1], [0, 0, 0, 1, 1, 1], [0], [0]>} : vector<2x8x128xbf16>, vector<2x8x128xbf16>, vector<2x8x8xf32> -> vector<2x8x8xf32>
    "tpu.trace_stop"() : () -> ()
    %cst_2 = arith.constant 0.176776692 : f32
    %3 = vector.broadcast %cst_2 : f32 to vector<2x8x8xf32>
    %4 = arith.mulf %2, %3 : vector<2x8x8xf32>
    %cst_3 = arith.constant dense<0xFF800000> : vector<2x8xf32>
    %5 = vector.multi_reduction <maximumf>, %4, %cst_3 [2] : vector<2x8x8xf32> to vector<2x8xf32>
    %6 = vector.shape_cast %5 : vector<2x8xf32> to vector<2x8x1xf32>
    %7 = vector.broadcast %6 : vector<2x8x1xf32> to vector<2x8x8xf32>
    %8 = arith.subf %4, %7 : vector<2x8x8xf32>
    %9 = math.exp %8 : vector<2x8x8xf32>
    %cst_4 = arith.constant dense<0.000000e+00> : vector<2x8xf32>
    %10 = vector.multi_reduction <add>, %9, %cst_4 [2] : vector<2x8x8xf32> to vector<2x8xf32>
    %11 = vector.shape_cast %10 : vector<2x8xf32> to vector<2x8x1xf32>
    %cst_5 = arith.constant 1.000000e+00 : f32
    %12 = vector.broadcast %cst_5 : f32 to vector<2x8x1xf32>
    %13 = arith.divf %12, %11 : vector<2x8x1xf32>
    %14 = vector.broadcast %13 : vector<2x8x1xf32> to vector<2x8x8xf32>
    %15 = arith.mulf %9, %14 : vector<2x8x8xf32>
    %16 = arith.truncf %15 : vector<2x8x8xf32> to vector<2x8x8xbf16>
    "tpu.trace_start"() <{level = 10 : i32, message = "gts,gsd->gtd"}> : () -> ()
    %cst_6 = arith.constant dense<0.000000e+00> : vector<2x8x128xf32>
    %17 = tpu.matmul %16, %1, %cst_6 {dimension_numbers = #tpu.dot_dimension_numbers<[2], [1], [1], [2], [0, 0, 0, 1, 1, 2], [0], [0]>} : vector<2x8x8xbf16>, vector<2x8x128xbf16>, vector<2x8x128xf32> -> vector<2x8x128xf32>
    "tpu.trace_stop"() : () -> ()
    %18 = tpu.iota {dimensions = array<i32: 1>} : vector<1x128xi32>
    %c32_i32 = arith.constant 32 : i32
    %19 = vector.broadcast %c32_i32 : i32 to vector<1x128xi32>
    %20 = arith.cmpi slt, %18, %19 : vector<1x128xi32>
    %c0_7 = arith.constant 0 : index
    %c0_8 = arith.constant 0 : index
    %21 = vector.load %arg4[%c0_7, %c0_8] : memref<4x128xf32, #tpu.memory_space<vmem>>, vector<1x128xf32>
    %c1 = arith.constant 1 : index
    %c0_9 = arith.constant 0 : index
    %22 = vector.load %arg4[%c1, %c0_9] : memref<4x128xf32, #tpu.memory_space<vmem>>, vector<1x128xf32>
    %c2 = arith.constant 2 : index
    %c0_10 = arith.constant 0 : index
    %23 = vector.load %arg4[%c2, %c0_10] : memref<4x128xf32, #tpu.memory_space<vmem>>, vector<1x128xf32>
    %c3 = arith.constant 3 : index
    %c0_11 = arith.constant 0 : index
    %24 = vector.load %arg4[%c3, %c0_11] : memref<4x128xf32, #tpu.memory_space<vmem>>, vector<1x128xf32>
    %25 = arith.addf %0, %17 : vector<2x8x128xf32>
    %26 = vector.shape_cast %25 : vector<2x8x128xf32> to vector<16x128xf32>
    %cst_12 = arith.constant dense<0.000000e+00> : vector<16xf32>
    %27 = vector.multi_reduction <add>, %26, %cst_12 [1] : vector<16x128xf32> to vector<16xf32>
    %28 = vector.shape_cast %27 : vector<16xf32> to vector<16x1xf32>
    %cst_13 = arith.constant 3.125000e-02 : f32
    %29 = vector.broadcast %cst_13 : f32 to vector<16x1xf32>
    %30 = arith.mulf %28, %29 : vector<16x1xf32>
    %31 = vector.broadcast %30 : vector<16x1xf32> to vector<16x128xf32>
    %32 = arith.subf %26, %31 : vector<16x128xf32>
    %cst_14 = arith.constant 0.000000e+00 : f32
    %33 = vector.shape_cast %20 : vector<1x128xi1> to vector<1x128xi1>
    %34 = vector.broadcast %33 : vector<1x128xi1> to vector<16x128xi1>
    %35 = vector.broadcast %cst_14 : f32 to vector<16x128xf32>
    %36 = arith.select %34, %32, %35 : vector<16x128xi1>, vector<16x128xf32>
    %37 = arith.mulf %36, %36 : vector<16x128xf32>
    %cst_15 = arith.constant dense<0.000000e+00> : vector<16xf32>
    %38 = vector.multi_reduction <add>, %37, %cst_15 [1] : vector<16x128xf32> to vector<16xf32>
    %39 = vector.shape_cast %38 : vector<16xf32> to vector<16x1xf32>
    %cst_16 = arith.constant 3.125000e-02 : f32
    %40 = vector.broadcast %cst_16 : f32 to vector<16x1xf32>
    %41 = arith.mulf %39, %40 : vector<16x1xf32>
    %cst_17 = arith.constant 9.99999974E-6 : f32
    %42 = vector.broadcast %cst_17 : f32 to vector<16x1xf32>
    %43 = arith.addf %41, %42 : vector<16x1xf32>
    %44 = math.rsqrt %43 : vector<16x1xf32>
    %45 = vector.broadcast %44 : vector<16x1xf32> to vector<16x128xf32>
    %46 = arith.mulf %36, %45 : vector<16x128xf32>
    %47 = vector.broadcast %21 : vector<1x128xf32> to vector<16x128xf32>
    %48 = arith.mulf %46, %47 : vector<16x128xf32>
    %49 = vector.broadcast %22 : vector<1x128xf32> to vector<16x128xf32>
    %50 = arith.addf %48, %49 : vector<16x128xf32>
    %51 = arith.truncf %50 : vector<16x128xf32> to vector<16x128xbf16>
    %c0_18 = arith.constant 0 : index
    %c0_19 = arith.constant 0 : index
    %52 = vector.load %arg2[%c0_18, %c0_19] : memref<128x128xbf16, #tpu.memory_space<vmem>>, vector<128x128xbf16>
    %cst_20 = arith.constant dense<0.000000e+00> : vector<16x128xf32>
    %53 = tpu.matmul %51, %52, %cst_20 {dimension_numbers = #tpu.dot_dimension_numbers<[1], [0], [0], [1], [0, 0, 1, 1], [], []>} : vector<16x128xbf16>, vector<128x128xbf16>, vector<16x128xf32> -> vector<16x128xf32>
    %cst_21 = arith.constant 0.000000e+00 : f32
    %54 = vector.broadcast %cst_21 : f32 to vector<16x128xf32>
    %55 = arith.maximumf %53, %54 : vector<16x128xf32>
    %56 = arith.truncf %55 : vector<16x128xf32> to vector<16x128xbf16>
    %c0_22 = arith.constant 0 : index
    %c0_23 = arith.constant 0 : index
    %57 = vector.load %arg3[%c0_22, %c0_23] : memref<128x128xbf16, #tpu.memory_space<vmem>>, vector<128x128xbf16>
    %cst_24 = arith.constant dense<0.000000e+00> : vector<16x128xf32>
    %58 = tpu.matmul %56, %57, %cst_24 {dimension_numbers = #tpu.dot_dimension_numbers<[1], [0], [0], [1], [0, 0, 1, 1], [], []>} : vector<16x128xbf16>, vector<128x128xbf16>, vector<16x128xf32> -> vector<16x128xf32>
    %59 = arith.addf %50, %58 : vector<16x128xf32>
    %cst_25 = arith.constant dense<0.000000e+00> : vector<16xf32>
    %60 = vector.multi_reduction <add>, %59, %cst_25 [1] : vector<16x128xf32> to vector<16xf32>
    %61 = vector.shape_cast %60 : vector<16xf32> to vector<16x1xf32>
    %cst_26 = arith.constant 3.125000e-02 : f32
    %62 = vector.broadcast %cst_26 : f32 to vector<16x1xf32>
    %63 = arith.mulf %61, %62 : vector<16x1xf32>
    %64 = vector.broadcast %63 : vector<16x1xf32> to vector<16x128xf32>
    %65 = arith.subf %59, %64 : vector<16x128xf32>
    %cst_27 = arith.constant 0.000000e+00 : f32
    %66 = vector.shape_cast %20 : vector<1x128xi1> to vector<1x128xi1>
    %67 = vector.broadcast %66 : vector<1x128xi1> to vector<16x128xi1>
    %68 = vector.broadcast %cst_27 : f32 to vector<16x128xf32>
    %69 = arith.select %67, %65, %68 : vector<16x128xi1>, vector<16x128xf32>
    %70 = arith.mulf %69, %69 : vector<16x128xf32>
    %cst_28 = arith.constant dense<0.000000e+00> : vector<16xf32>
    %71 = vector.multi_reduction <add>, %70, %cst_28 [1] : vector<16x128xf32> to vector<16xf32>
    %72 = vector.shape_cast %71 : vector<16xf32> to vector<16x1xf32>
    %cst_29 = arith.constant 3.125000e-02 : f32
    %73 = vector.broadcast %cst_29 : f32 to vector<16x1xf32>
    %74 = arith.mulf %72, %73 : vector<16x1xf32>
    %cst_30 = arith.constant 9.99999974E-6 : f32
    %75 = vector.broadcast %cst_30 : f32 to vector<16x1xf32>
    %76 = arith.addf %74, %75 : vector<16x1xf32>
    %77 = math.rsqrt %76 : vector<16x1xf32>
    %78 = vector.broadcast %77 : vector<16x1xf32> to vector<16x128xf32>
    %79 = arith.mulf %69, %78 : vector<16x128xf32>
    %80 = vector.broadcast %23 : vector<1x128xf32> to vector<16x128xf32>
    %81 = arith.mulf %79, %80 : vector<16x128xf32>
    %82 = vector.broadcast %24 : vector<1x128xf32> to vector<16x128xf32>
    %83 = arith.addf %81, %82 : vector<16x128xf32>
    %84 = vector.shape_cast %83 : vector<16x128xf32> to vector<2x8x128xf32>
    %c0_31 = arith.constant 0 : index
    %c0_32 = arith.constant 0 : index
    %c0_33 = arith.constant 0 : index
    %85 = vector.load %arg5[%c0_31, %c0_32, %c0_33] : memref<2x8x128xf32, #tpu.memory_space<vmem>>, vector<2x8x128xf32>
    tpu.vector_store %arg5[%c0_31, %c0_32, %c0_33], %84 {strides = array<i32>} : memref<2x8x128xf32, #tpu.memory_space<vmem>>, vector<2x8x128xf32>,
    %86 = arith.truncf %15 : vector<2x8x8xf32> to vector<2x8x8xbf16>
    %c0_34 = arith.constant 0 : index
    %c0_35 = arith.constant 0 : index
    %c0_36 = arith.constant 0 : index
    %87 = vector.load %arg6[%c0_34, %c0_35, %c0_36] : memref<2x8x8xbf16, #tpu.memory_space<vmem>>, vector<2x8x8xbf16>
    tpu.vector_store %arg6[%c0_34, %c0_35, %c0_36], %86 {strides = array<i32>} : memref<2x8x8xbf16, #tpu.memory_space<vmem>>, vector<2x8x8xbf16>,
    return
  }
  func.func @transform_0(%arg0: i32) -> (i32, i32, i32) {
    %c0_i32 = arith.constant 0 : i32
    %c0_i32_0 = arith.constant 0 : i32
    %c0_i32_1 = arith.constant 0 : i32
    return %arg0, %c0_i32, %c0_i32_0 : i32, i32, i32
  }
  func.func @transform_1(%arg0: i32) -> (i32, i32) {
    %c0_i32 = arith.constant 0 : i32
    %c0_i32_0 = arith.constant 0 : i32
    %c0_i32_1 = arith.constant 0 : i32
    return %c0_i32, %c0_i32_0 : i32, i32
  }
  func.func @transform_2(%arg0: i32) -> (i32, i32) {
    %c0_i32 = arith.constant 0 : i32
    %c0_i32_0 = arith.constant 0 : i32
    %c0_i32_1 = arith.constant 0 : i32
    return %c0_i32, %c0_i32_0 : i32, i32
  }
  func.func @transform_3(%arg0: i32) -> (i32, i32) {
    %c0_i32 = arith.constant 0 : i32
    %c0_i32_0 = arith.constant 0 : i32
    %c0_i32_1 = arith.constant 0 : i32
    return %c0_i32, %c0_i32_0 : i32, i32
  }
  func.func @transform_4(%arg0: i32) -> (i32, i32, i32) {
    %c0_i32 = arith.constant 0 : i32
    %c0_i32_0 = arith.constant 0 : i32
    %c0_i32_1 = arith.constant 0 : i32
    return %arg0, %c0_i32, %c0_i32_0 : i32, i32, i32
  }
  func.func @transform_5(%arg0: i32) -> (i32, i32, i32) {
    %c0_i32 = arith.constant 0 : i32
    %c0_i32_0 = arith.constant 0 : i32
    %c0_i32_1 = arith.constant 0 : i32
    return %arg0, %c0_i32, %c0_i32_0 : i32, i32, i32
  }
}

</mosaic_0001>

<bundles_post_ra>
// kernel: tpu_custom_call.1
= control target key start
LH: loop header
LB: loop body
LE: loop exit
PB: predicated region body
PF: predicated region fallthrough
CT: control target
= control target key end

     0   :  { %11 = vsyncpa [#allocation3], 0  ;;  %s1730_s0 = inlined_call_operand.hbm [shape: f32[8,8,128], index: 0, kind: input, shape index: {}]   ;;  %s1731_s1 = inlined_call_operand.hbm [shape: bf16[128,128], index: 1, kind: input, shape index: {}]   ;;  %s1732_s2 = inlined_call_operand.hbm [shape: bf16[128,128], index: 2, kind: input, shape index: {}]   ;;  %s1733_s3 = inlined_call_operand.vmem [shape: f32[4,128], index: 3, kind: input, shape index: {}]   ;;  %s1734_s4 = inlined_call_operand.hbm [shape: f32[8,8,128], index: 4, kind: output, shape index: {0}]   ;;  %s1735_s5 = inlined_call_operand.hbm [shape: bf16[8,8,8], index: 5, kind: output, shape index: {1}]  }
   0x1   :  { %13 = vsyncpa [#allocation3 + $0x1], 0 }
   0x2   :  { %14 = vsyncpa [#allocation6], 0 }
   0x3   :  { %15 = vsyncpa [#allocation4], 0 }
   0x4   :  { %17 = vsyncpa [#allocation4 + $0x1], 0 }
   0x5   :  { %18 = vsyncpa [#allocation10], 0 }
   0x6   :  { %20 = vsyncpa [#allocation10 + $0x1], 0  ;;  %s1432_s18 = smov 0   ;;  %s1434_s19 = smov 0  }
   0x7   :  { %s1436_s20 = smov 0   ;;  %s1438_s21 = smov 0  }
   0x8 LB: > { %s1453_s22 = sadd.s32 4294967295, %s1385_s21   ;;  %s956_s23 = sadd.s32 4294967294, %s1385_s21   ;;  %s1385_s21 = sphi %s1438_s21, %s1756_s21   ;;  %s1381_s20 = sphi %s1436_s20, %s1755_s20   ;;  %s1377_s19 = sphi %s1434_s19, %s1754_s19   ;;  %s1373_s18 = sphi %s1432_s18, %s1753_s18  }
   0x9   : > { %p46_p0 = scmp.ne.s32.totalorder %s1377_s19, %s1373_s18  ;;  %p1736_p1 = scmp.eq.s32.totalorder %s1453_s22, 0 }
   0xa   : > { %p139_p3 = scmp.eq.s32.totalorder %s956_s23, 3  ;;  %p957_p5 = scmp.ge.s32.totalorder %s1385_s21, 1 }
   0xb   : > { %p1462_p4 = por %p1736_p1, %p46_p0  ;;  %p172_p7 = scmp.lt.s32.totalorder %s1385_s21, 5 }
   0xc   : > { %p1467_p6 = por %p139_p3, %p46_p0  ;;  %s1387_s27 = smov [#allocation5]  }
   0xd   : > { %s1740_s24 = scalar_select %p1462_p4, 1, 0 }
   0xe   : > { %s1741_s25 = scalar_select %p1467_p6, 1, 0 }
   0xf   : > { %p1472_p8 = pnand %p957_p5, %p172_p7  ;;  %s184_s28 = sshll.u32 %s1387_s27, 4  ;;  %s185_s28 = int_to_ptr.vmem [resolvable:$true] %s184_s28 }
  0x10   : > { %s1388_s30 = smov [#allocation7]   ;;  %s1218_s7 = scalar_lea.vmem %s185_s28, 1024 }
  0x11   : > { %s1742_s26 = scalar_select %p1472_p8, 1, 0 }
  0x12   : > { %p1107_p9 = pneg %p1472_p8  ;;  %s197_s6 = sshll.u32 %s1388_s30, 4  ;;  %s198_s6 = int_to_ptr.vmem [resolvable:$true] %s197_s6 }
  0x13   : > { %p1219_p12 = scmp.ne.s32.totalorder %s185_s28, %s1218_s7  ;;  %p1226_p3 = scmp.lt.s32.totalorder %s185_s28, %s185_s28 }
  0x14   : > { %p1480_p10 = pnand %p1107_p9, %p1736_p1  ;;  %p1227_p5 = scmp.lt.s32.totalorder %s1218_s7, %s1218_s7 }
  0x16   : > { %p1209_p11 = pneg %p1480_p10  ;;  %p1228_p7 = por %p1227_p5, %p1226_p3 }
  0x18   : > { %p1221_p13 = pnand %p1219_p12, %p1209_p11 }
  0x1a   : > { %p1222_p0 = pneg %p1221_p13 }
  0x1c   : > { %p1229_p9 = pnand %p1228_p7, %p1222_p0 }
  0x1e   : > { %1232 = shalt.err (!%p1229_p9)
}
  0x1f   : > { %s1389_s8 = smov 64   ;;  %s1390_s9 = smov 4  }
  0x20   : > { %1110 = dma.hbm_to_vmem [thread:$0]  (!%p1480_p10), %s1731_s1, 1024, %s185_s28, [#allocation6], %s1389_s8, %s1389_s8, %s1390_s9  }
  0x21   : > { %s1244_s12 = scalar_lea.vmem %s198_s6, 1024  ;;  %p1252_p2 = scmp.lt.s32.totalorder %s198_s6, %s198_s6 }
  0x22   : > { %p1245_p1 = scmp.ne.s32.totalorder %s198_s6, %s1244_s12  ;;  %p1253_p6 = scmp.lt.s32.totalorder %s1244_s12, %s1244_s12 }
  0x24   : > { %p1247_p12 = pnand %p1245_p1, %p1209_p11  ;;  %p1254_p3 = por %p1253_p6, %p1252_p2 }
  0x26   : > { %p1248_p13 = pneg %p1247_p12 }
  0x28   : > { %p1255_p0 = pnand %p1254_p3, %p1248_p13 }
  0x2a   : > { %1258 = shalt.err (!%p1255_p0)
}
  0x2b   : > { %1113 = dma.hbm_to_vmem [thread:$0]  (!%p1480_p10), %s1732_s2, 1024, %s198_s6, [#allocation6], %s1389_s8, %s1389_s8, %s1390_s9  }
  0x2c   : > { %s1503_s15 = sadd.s32 1, %s1385_s21   ;;  %s33_s16 = sadd.s32 1, %s1381_s20 }
  0x2d   : > { %s30_s17 = ssub.s32 %s1385_s21, %s1503_s15  ;;  %p40_p1 = scmp.ne.s32.totalorder %s1381_s20, %s1377_s19 }
  0x2e   : > { %p31_p2 = scmp.eq.s32.totalorder %s30_s17, 0  ;;  %p41_p6 = scmp.eq.s32.totalorder %s1385_s21, 0 }
  0x2f   : > { %p1744_p11 = scmp.eq.s32.totalorder %s1453_s22, 3  ;;  %p1127_p7 = scmp.lt.s32.totalorder %s1385_s21, 4 }
  0x30   : > { %s1519_s27 = scalar_select %p31_p2, %s1381_s20, %s33_s16  }
  0x31   : > { %p1513_p5 = por %p1744_p11, %p40_p1  ;;  %p42_p9 = por %p41_p6, %p40_p1 }
  0x32   : > { %s214_s28 = sand.u32 1, %s1381_s20   ;;  %s1000_s30 = sshll.u32 %s1385_s21, 8 }
  0x33   : > { %s1745_s23 = scalar_select %p1513_p5, 1, 0 }
  0x34   : > { %s961_s29 = sshll.u32 %s214_s28, 4  ;;  %s1526_s8 = scalar_lea.hbm %s1730_s0, %s1000_s30 }
  0x35   : > { %s218_s9 = scalar_lea.vmem [#allocation2], %s961_s29  ;;  %p1530_p10 = pnand %p1127_p7, %p42_p9 }
  0x36   : > { %s225_s10 = sshll.u32 %s218_s9, 4  ;;  %s1534_s12 = scalar_lea.sflag [#allocation3], %s214_s28  ;;  %s1528_s10 = int_to_ptr.vmem [resolvable:$true] %s225_s10 }
  0x37   : > { %s1259_s13 = scalar_lea.hbm %s1526_s8, 256  ;;  %p1261_p13 = pneg %p1530_p10 }
  0x38   : > { %p1260_p12 = scmp.ne.s32.totalorder %s1526_s8, %s1259_s13  ;;  %s1264_s17 = scalar_lea.hbm %s1730_s0, 1024 }
  0x39   : > { %p1265_p1 = scmp.lt.s32.totalorder %s1526_s8, %s1730_s0  ;;  %p1266_p2 = scmp.lt.s32.totalorder %s1264_s17, %s1259_s13 }
  0x3a   : > { %p1262_p3 = pnand %p1261_p13, %p1260_p12 }
  0x3b   : > { %p1267_p6 = por %p1266_p2, %p1265_p1 }
  0x3c   : > { %p1263_p0 = pneg %p1262_p3 }
  0x3e   : > { %p1268_p11 = pnand %p1267_p6, %p1263_p0 }
  0x40   : > { %1271 = shalt.err (!%p1268_p11)
}
  0x41   : > { %s1272_s28 = scalar_lea.vmem %s1528_s10, 256  ;;  %s1391_s6 = smov [#allocation2]  }
  0x42   : > { %p1273_p7 = scmp.ne.s32.totalorder %s1528_s10, %s1272_s28  ;;  %s1277_s7 = sshll.u32 %s1391_s6, 4  ;;  %s1278_s7 = int_to_ptr.vmem [resolvable:$false] %s1277_s7 }
  0x43   : > { %s1279_s9 = scalar_lea.vmem %s1278_s7, 512  ;;  %p1280_p3 = scmp.lt.s32.totalorder %s1528_s10, %s1278_s7 }
  0x44   : > { %p1275_p9 = pnand %p1273_p7, %p1261_p13  ;;  %p1281_p5 = scmp.lt.s32.totalorder %s1279_s9, %s1272_s28 }
  0x46   : > { %p1276_p12 = pneg %p1275_p9  ;;  %p1282_p4 = por %p1281_p5, %p1280_p3 }
  0x48   : > { %p1283_p8 = pnand %p1282_p4, %p1276_p12 }
  0x4a   : > { %1286 = shalt.err (!%p1283_p8)
}
  0x4b   : > { %s1392_s13 = smov 128   ;;  %s1393_s14 = smov 8  }
  0x4c   : > { %1117 = dma.hbm_to_vmem [thread:$0]  (!%p1530_p10), %s1526_s8, 256, %s1528_s10, %s1534_s12, %s1392_s13, %s1392_s13, %s1393_s14  }
  0x4d   : > { %p1747_p13 = scmp.ne.s32.totalorder %s1742_s26, 0 }
  0x4e   : > { %s1558_s16 = sand.u32 (!%p1747_p13), 1, %s1377_s19   ;;  %p1748_p4 = scmp.ne.s32.totalorder (!%p1747_p13), %s1740_s24, 0 }
  0x4f   : > { %237 = sbr.rel (%p1747_p13) target bundleno = 1836 (0x72c), region = 36  ;;  %s965_s17 = sshll.u32 (!%p1747_p13), %s1558_s16, 4 }
  0x50   : > { %s240_s29 = scalar_lea.sflag (!%p1747_p13), [#allocation3], %s1558_s16  ;;  %s243_s30 = scalar_lea.vmem (!%p1747_p13), [#allocation2], %s965_s17 }
  0x54   : > { %1356 = dma.done.wait (%p1748_p4), %s240_s29, 256  }
  0x55   : > { %1358 = vsyncadd (%p1748_p4), %s240_s29, 4294967040  ;;  %p1749_p8 = scmp.eq.s32.totalorder %s1453_s22, 0 }
  0x57   : > { %1360 = dma.done.wait (%p1749_p8), [#allocation6], 2048   ;;  %p1750_p5 = pmov %p1749_p8 }
  0x58   : > { %v1394_v0 = vmov 0.0   ;;  %vm1395_vm0 = vmmov 0   ;;  %v1578_v1 = vld [vmem:[%s243_s30] sm:$0xff]  ;;  %v1580_v2 = vld [vmem:[%s243_s30 + $0x8] sm:$0xff]  ;;  %vm373_vm1 = vcmask 64512   ;;  %vm403_vm2 = vcmask 1043456  }
  0x59   : > { %1362 = vsyncadd (%p1750_p5), [#allocation6], 4294965248  ;;  %1029 = vmatprep.subr.bf16.mxu0 %v1394_v0  ;;  %1035 = vmatprep.subr.bf16.mxu1 %v1394_v0  ;;  %v289_v3 = vpack.c.bf16 %v1578_v1, %v1578_v1  ;;  %v290_v4 = vpack.c.bf16 %v1580_v2, %v1580_v2  ;;  %s969_s24 = sshll.u32 %s1558_s16, 3  ;;  %vm794_vm3 = vcmask 60416   ;;  %v1175_v47 = vld [vmem:[#allocation5 + $0x38] sm:$0xff]   ;;  %v493_v48 = vlaneseq  ;;  %v1176_v60 = vld [vmem:[#allocation5 + $0x30] sm:$0xff]  }
  0x5a   : > { %1031 = vmatprep.mubr.msk.bf16.mxu0 %vm1395_vm0, %v1394_v0  ;;  %1037 = vmatprep.mubr.msk.bf16.mxu1 %vm1395_vm0, %v1394_v0  ;;  %s1600_s26 = scalar_lea.vmem [#allocation9], %s969_s24  ;;  %v1177_v61 = vld [vmem:[#allocation5 + $0x28] sm:$0xff]   ;;  %v1178_v62 = vld [vmem:[#allocation5 + $0x20] sm:$0xff]   ;;  %v1179_v63 = vld [vmem:[#allocation5 + $0x18] sm:$0xff]   ;;  %s1002_s28 = sshll.u32 %s1453_s22, 7 }
  0x5b   : > { %1030 = vmatpush3.bf16.xpose.msra.mxu0 %v289_v3  ;;  %1036 = vmatpush3.bf16.xpose.msra.mxu1 %v290_v4  ;;  %v405_v27 = vsel %vm403_vm2, %v289_v3, 0  ;;  %v451_v28 = vsel %vm403_vm2, %v290_v4, 0  ;;  %v1612_v49 = vand.u32 127, %v493_v48  ;;  %s832_s6 = sshll.u32 %s1600_s26, 4  ;;  %s1647_s13 = scalar_lea.hbm %s1735_s5, %s1002_s28  ;;  %s1649_s6 = int_to_ptr.vmem [resolvable:$true] %s832_s6 }
  0x5c   : > { %1041 = vmatprep.subr.bf16.mxu0 %v1394_v0  ;;  %1047 = vmatprep.subr.bf16.mxu1 %v1394_v0  ;;  %s803_s14 = scalar_lea.sflag [#allocation10], %s1558_s16  ;;  %s1287_s29 = scalar_lea.vmem %s1649_s6, 128 }
  0x5d   : > { %vm495_vm4 = vcmp.lt.s32.totalorder %v1612_v49, 32  ;;  %p1288_p10 = scmp.ne.s32.totalorder %s1649_s6, %s1287_s29  ;;  %p1751_p0 = scmp.ne.s32.totalorder %s1745_s23, 0 }
  0x5e   : > { %s1396_s30 = smov [#allocation9]  }
  0x5f   : > { %p1289_p1 = pnand %p1288_p10, %p1751_p0  ;;  %s1291_s24 = sshll.u32 %s1396_s30, 4  ;;  %s1292_s24 = int_to_ptr.vmem [resolvable:$false] %s1291_s24 }
  0x60   : > { %p1294_p6 = scmp.lt.s32.totalorder %s1649_s6, %s1292_s24 }
  0x61   : > { %p1290_p2 = pneg %p1289_p1 }
  0x62   : > { %1032 = vmatmul.mubr.bf16.vlgmr.msra.gmra.mxu0 %v289_v3  ;;  %1038 = vmatmul.mubr.bf16.vlgmr.msra.gmra.mxu1 %v290_v4  ;;  %v1182_v3 = vld [vmem:[#allocation5] sm:$0xff]   ;;  %v1183_v4 = vld [vmem:[#allocation7 + $0x38] sm:$0xff]  }
  0x63   : > { %1043 = vmatprep.mubr.msk.bf16.mxu0 %vm1395_vm0, %v1394_v0  ;;  %1049 = vmatprep.mubr.msk.bf16.mxu1 %vm1395_vm0, %v1394_v0 }
  0x64   : > { %1042 = vmatpush3.bf16.msra.mxu0 %v405_v27  ;;  %1048 = vmatpush3.bf16.msra.mxu1 %v451_v28  ;;  %v1189_v27 = vld [vmem:[#allocation7 + $0x8] sm:$0xff]   ;;  %v1190_v28 = vld [vmem:[#allocation7] sm:$0xff]  }
  0x65   : > { %1053 = vmatprep.subr.bf16.mxu0 %v1394_v0  ;;  %1073 = vmatprep.subr.bf16.mxu1 %v1394_v0 }
 0x122   : > { %v325_v5 = vpop.f32.mrf.mxu0  ;;  %v365_v6 = vpop.f32.mrf.mxu1 }
 0x123   : > { %v371_v7 = vmul.f32 0.17677669, %v325_v5  ;;  %v372_v8 = vmul.f32 0.17677669, %v365_v6  ;;  %v1184_v5 = vld [vmem:[#allocation7 + $0x30] sm:$0xff]   ;;  %v1185_v6 = vld [vmem:[#allocation7 + $0x28] sm:$0xff]  }
 0x124   : > { %v1033_v9 = vpop.f32.mrf.mxu0  ;;  %v1039_v10 = vpop.f32.mrf.mxu1 }
 0x125   : > { %v374_v11 = vsel %vm373_vm1, %v371_v7, -inf  ;;  %v377_v14 = vsel %vm373_vm1, %v372_v8, -inf  ;;  %v1188_v9 = vld [vmem:[#allocation7 + $0x10] sm:$0xff]  }
 0x126   : > { %v368_v12 = vpop.f32.mrf.mxu1  ;;  %375 = vmax.xlane.f32.xlu0 %v374_v11  ;;  %v328_v13 = vpop.f32.mrf.mxu0 }
 0x128   : > { %v1034_v15 = vpop.f32.mrf.mxu0  ;;  %v1040_v16 = vpop.f32.mrf.mxu1 }
 0x12a   : > { %378 = vmax.xlane.f32.xlu0 %v377_v14 }
 0x1af   : > { %v376_v17 = vpop.xlane.xlu0 %375 }
 0x1b0   : > { %v380_v18 = vsub.f32 %v371_v7, %v376_v17  ;;  %v1186_v7 = vld [vmem:[#allocation7 + $0x20] sm:$0xff]  }
 0x1b2   : > { %v382_v19 = vmul.f32 1.442695, %v380_v18  ;;  %v972_v18 = vld [vmem:[%s1733_s3] ss:$0 sm:$0xff] }
 0x1b3   : > { %v379_v20 = vpop.xlane.xlu0 %378 }
 0x1b4   : > { %1191 = vpow2.f32 %v382_v19  ;;  %v381_v21 = vsub.f32 %v372_v8, %v379_v20  ;;  %v1187_v8 = vld [vmem:[#allocation7 + $0x18] sm:$0xff]  }
 0x1b6   : > { %v384_v22 = vmul.f32 1.442695, %v381_v21 }
 0x1b8   : > { %1193 = vpow2.f32 %v384_v22  ;;  %v973_v22 = vld [vmem:[%s1733_s3 + $0x1] ss:$0 sm:$0xff] }
 0x1c1   : > { %v1192_v23 = vpop.eup %1191 }
 0x1c2   : > { %v386_v24 = vsel %vm373_vm1, %v1192_v23, 0.0 }
 0x1c3   : > { %387 = vadd.xlane.f32.xlu1 %v386_v24 }
 0x1c5   : > { %v1194_v25 = vpop.eup %1193 }
 0x1c6   : > { %v389_v26 = vsel %vm373_vm1, %v1194_v25, 0.0 }
 0x1c7   : > { %390 = vadd.xlane.f32.xlu1 %v389_v26 }
 0x24c   : > { %v388_v29 = vpop.xlane.xlu1 %387 }
 0x24d   : > { %1195 = vrcp.f32 %v388_v29 }
 0x250   : > { %v391_v30 = vpop.xlane.xlu1 %390 }
 0x251   : > { %1197 = vrcp.f32 %v391_v30 }
 0x25a   : > { %v1196_v31 = vpop.eup %1195 }
 0x25b   : > { %v396_v32 = vmul.f32 %v1196_v31, %v1192_v23 }
 0x25d   : > { %v398_v33 = vpack.c.bf16 %v396_v32, %v396_v32 }
 0x25e   : > { %v1198_v34 = vpop.eup %1197 }
 0x25f   : > { %1044 = vmatmul.mubr.msk.bf16.vlgmr.msra.gmra.mxu0 %vm373_vm1, %v398_v33  ;;  %v397_v35 = vmul.f32 %v1198_v34, %v1194_v25  ;;  %795 = vst.msk [vmem:[%s1600_s26] sm:$0xf] %vm794_vm3, %v398_v33 }
 0x260   : > { %1069 = vmatprep.mubr.msk.bf16.mxu0 %vm1395_vm0, %v1394_v0  ;;  %1054 = vmatpush3.bf16.msra.mxu0 %v1175_v47 }
 0x261   : > { %v399_v36 = vpack.c.bf16 %v397_v35, %v397_v35  ;;  %1055 = vmatprep.subr.bf16.mxu0 %v1394_v0 }
 0x263   : > { %1050 = vmatmul.mubr.msk.bf16.vlgmr.msra.gmra.mxu1 %vm373_vm1, %v399_v36  ;;  %796 = vst.msk [vmem:[%s1600_s26 + $0x4] sm:$0xf] %vm794_vm3, %v399_v36  ;;  %s1293_s26 = scalar_lea.vmem %s1292_s24, 256 }
 0x264   : > { %1089 = vmatprep.mubr.msk.bf16.mxu1 %vm1395_vm0, %v1394_v0  ;;  %1056 = vmatpush3.bf16.msra.mxu0 %v1176_v60  ;;  %p1295_p11 = scmp.lt.s32.totalorder %s1293_s26, %s1287_s29 }
 0x265   : > { %1057 = vmatprep.subr.bf16.mxu0 %v1394_v0  ;;  %1074 = vmatpush3.bf16.msra.mxu1 %v1183_v4 }
 0x266   : > { %1075 = vmatprep.subr.bf16.mxu1 %v1394_v0  ;;  %p1296_p7 = por %p1295_p11, %p1294_p6 }
 0x268   : > { %1058 = vmatpush3.bf16.msra.mxu0 %v1177_v61  ;;  %p1297_p9 = pnand %p1296_p7, %p1290_p2 }
 0x269   : > { %1059 = vmatprep.subr.bf16.mxu0 %v1394_v0  ;;  %1076 = vmatpush3.bf16.msra.mxu1 %v1184_v5 }
 0x26a   : > { %1077 = vmatprep.subr.bf16.mxu1 %v1394_v0 }
 0x26c   : > { %1060 = vmatpush3.bf16.msra.mxu0 %v1178_v62 }
 0x26d   : > { %1061 = vmatprep.subr.bf16.mxu0 %v1394_v0  ;;  %1078 = vmatpush3.bf16.msra.mxu1 %v1185_v6 }
 0x26e   : > { %1079 = vmatprep.subr.bf16.mxu1 %v1394_v0 }
 0x270   : > { %1062 = vmatpush3.bf16.msra.mxu0 %v1179_v63 }
 0x271   : > { %1063 = vmatprep.subr.bf16.mxu0 %v1394_v0  ;;  %1080 = vmatpush3.bf16.msra.mxu1 %v1186_v7 }
 0x272   : > { %1081 = vmatprep.subr.bf16.mxu1 %v1394_v0 }
 0x275   : > { %1082 = vmatpush3.bf16.msra.mxu1 %v1187_v8 }
 0x276   : > { %1083 = vmatprep.subr.bf16.mxu1 %v1394_v0 }
 0x279   : > { %1084 = vmatpush3.bf16.msra.mxu1 %v1188_v9 }
 0x27a   : > { %1085 = vmatprep.subr.bf16.mxu1 %v1394_v0 }
 0x27d   : > { %1086 = vmatpush3.bf16.msra.mxu1 %v1189_v27 }
 0x27e   : > { %1087 = vmatprep.subr.bf16.mxu1 %v1394_v0 }
 0x281   : > { %1088 = vmatpush3.bf16.msra.mxu1 %v1190_v28 }
 0x31f   : > { %v441_v37 = vpop.f32.mrf.mxu0 }
 0x320   : > { %v500_v38 = vadd.f32 %v441_v37, %v1578_v1  ;;  %v1180_v1 = vld [vmem:[#allocation5 + $0x10] sm:$0xff]  }
 0x321   : > { %v1045_v39 = vpop.f32.mrf.mxu0  ;;  %1064 = vmatpush3.bf16.msra.mxu0 %v1180_v1 }
 0x322   : > { %502 = vadd.xlane.f32.xlu0 %v500_v38  ;;  %1065 = vmatprep.subr.bf16.mxu0 %v1394_v0 }
 0x323   : > { %v444_v40 = vpop.f32.mrf.mxu0  ;;  %v487_v41 = vpop.f32.mrf.mxu1 }
 0x324   : > { %v501_v42 = vadd.f32 %v487_v41, %v1580_v2  ;;  %v1181_v2 = vld [vmem:[#allocation5 + $0x8] sm:$0xff]  }
 0x325   : > { %v1046_v43 = vpop.f32.mrf.mxu0  ;;  %v1051_v44 = vpop.f32.mrf.mxu1  ;;  %1066 = vmatpush3.bf16.msra.mxu0 %v1181_v2 }
 0x326   : > { %504 = vadd.xlane.f32.xlu1 %v501_v42  ;;  %1067 = vmatprep.subr.bf16.mxu0 %v1394_v0 }
 0x327   : > { %v490_v45 = vpop.f32.mrf.mxu1 }
 0x329   : > { %v1052_v46 = vpop.f32.mrf.mxu1  ;;  %1068 = vmatpush3.bf16.msra.mxu0 %v1182_v3 }
 0x3ab   : > { %v503_v50 = vpop.xlane.xlu0 %502 }
 0x3ac   : > { %v506_v51 = vmul.f32 0.03125, %v503_v50 }
 0x3ae   : > { %v508_v52 = vsub.f32 %v500_v38, %v506_v51 }
 0x3af   : > { %v505_v53 = vpop.xlane.xlu1 %504 }
 0x3b0   : > { %v507_v54 = vmul.f32 0.03125, %v505_v53  ;;  %v512_v55 = vsel %vm495_vm4, %v508_v52, 0.0 }
 0x3b1   : > { %v514_v56 = vmul.f32 %v512_v55, %v512_v55 }
 0x3b2   : > { %v509_v57 = vsub.f32 %v501_v42, %v507_v54 }
 0x3b3   : > { %516 = vadd.xlane.f32.xlu0 %v514_v56 }
 0x3b4   : > { %v513_v58 = vsel %vm495_vm4, %v509_v57, 0.0 }
 0x3b5   : > { %v515_v59 = vmul.f32 %v513_v58, %v513_v58 }
 0x3b7   : > { %518 = vadd.xlane.f32.xlu1 %v515_v59 }
 0x43c   : > { %v517_v10 = vpop.xlane.xlu0 %516 }
 0x43d   : > { %v520_v11 = vmul.f32 0.03125, %v517_v10 }
 0x43f   : > { %v522_v12 = vadd.f32 1e-05, %v520_v11 }
 0x440   : > { %v519_v13 = vpop.xlane.xlu1 %518 }
 0x441   : > { %1199 = vrsqrt.f32 %v522_v12  ;;  %v521_v14 = vmul.f32 0.03125, %v519_v13 }
 0x443   : > { %v523_v15 = vadd.f32 1e-05, %v521_v14 }
 0x445   : > { %1201 = vrsqrt.f32 %v523_v15 }
 0x44e   : > { %v1200_v16 = vpop.eup %1199 }
 0x44f   : > { %v526_v17 = vmul.f32 %v1200_v16, %v512_v55 }
 0x451   : > { %v532_v21 = vmul.f32 %v972_v18, %v526_v17 }
 0x452   : > { %v1202_v19 = vpop.eup %1201 }
 0x453   : > { %v527_v20 = vmul.f32 %v1202_v19, %v513_v58  ;;  %v538_v24 = vadd.f32 %v973_v22, %v532_v21 }
 0x455   : > { %v533_v23 = vmul.f32 %v972_v18, %v527_v20 }
 0x457   : > { %v539_v25 = vadd.f32 %v973_v22, %v533_v23 }
 0x459   : > { %v540_v26 = vpack.c.bf16 %v539_v25, %v538_v24 }
 0x45b   : > { %1070 = vmatmul.mubr.bf16.vlgmr.msra.gmra.mxu0 %v540_v26 }
 0x51b   : > { %v639_v29 = vpop.f32.mrf.mxu0 }
 0x51c   : > { %v646_v32 = vmax.f32 %v639_v29, 0.0 }
 0x51d   : > { %v1071_v30 = vpop.f32.mrf.mxu0 }
 0x51f   : > { %v642_v31 = vpop.f32.mrf.mxu0 }
 0x520   : > { %v647_v33 = vmax.f32 %v642_v31, 0.0 }
 0x521   : > { %v1072_v34 = vpop.f32.mrf.mxu0 }
 0x522   : > { %v648_v35 = vpack.c.bf16 %v647_v33, %v646_v32 }
 0x524   : > { %1090 = vmatmul.mubr.bf16.vlgmr.msra.gmra.mxu1 %v648_v35 }
 0x5e4   : > { %v747_v36 = vpop.f32.mrf.mxu1 }
 0x5e5   : > { %v754_v37 = vadd.f32 %v747_v36, %v538_v24 }
 0x5e6   : > { %v1091_v38 = vpop.f32.mrf.mxu1 }
 0x5e7   : > { %756 = vadd.xlane.f32.xlu0 %v754_v37 }
 0x5e8   : > { %v750_v39 = vpop.f32.mrf.mxu1 }
 0x5e9   : > { %v755_v40 = vadd.f32 %v750_v39, %v539_v25 }
 0x5ea   : > { %v1092_v41 = vpop.f32.mrf.mxu1 }
 0x5eb   : > { %758 = vadd.xlane.f32.xlu1 %v755_v40 }
 0x670   : > { %v757_v0 = vpop.xlane.xlu0 %756 }
 0x671   : > { %v760_v42 = vmul.f32 0.03125, %v757_v0 }
 0x673   : > { %v762_v43 = vsub.f32 %v754_v37, %v760_v42 }
 0x674   : > { %v759_v44 = vpop.xlane.xlu1 %758 }
 0x675   : > { %v761_v45 = vmul.f32 0.03125, %v759_v44  ;;  %v764_v46 = vsel %vm495_vm4, %v762_v43, 0.0 }
 0x676   : > { %v766_v47 = vmul.f32 %v764_v46, %v764_v46 }
 0x677   : > { %v763_v48 = vsub.f32 %v755_v40, %v761_v45 }
 0x678   : > { %768 = vadd.xlane.f32.xlu0 %v766_v47 }
 0x679   : > { %v765_v50 = vsel %vm495_vm4, %v763_v48, 0.0 }
 0x67a   : > { %v767_v51 = vmul.f32 %v765_v50, %v765_v50 }
 0x67c   : > { %770 = vadd.xlane.f32.xlu1 %v767_v51 }
 0x67d   : > { %1300 = shalt.err (!%p1297_p9)
}
 0x67e   : > { %s1301_s8 = scalar_lea.hbm %s1647_s13, 128  ;;  %s1305_s12 = scalar_lea.hbm %s1735_s5, 512 }
 0x67f   : > { %p1302_p12 = scmp.ne.s32.totalorder %s1647_s13, %s1301_s8  ;;  %p1306_p4 = scmp.lt.s32.totalorder %s1647_s13, %s1735_s5 }
 0x680   : > { %p1307_p8 = scmp.lt.s32.totalorder %s1305_s12, %s1301_s8 }
 0x681   : > { %p1303_p3 = pnand %p1302_p12, %p1751_p0 }
 0x682   : > { %p1308_p5 = por %p1307_p8, %p1306_p4 }
 0x683   : > { %p1304_p13 = pneg %p1303_p3 }
 0x685   : > { %p1309_p10 = pnand %p1308_p5, %p1304_p13 }
 0x687   : > { %1312 = shalt.err (!%p1309_p10)
}
 0x688   : > { %s1397_s9 = smov 64   ;;  %s1398_s29 = smov 4   ;;  %v990_v58 = vld [vmem:[%s1733_s3 + $0x2] ss:$0 sm:$0xff]  ;;  %v991_v60 = vld [vmem:[%s1733_s3 + $0x3] ss:$0 sm:$0xff] }
 0x689   : > { %1104 = dma.vmem_to_hbm [thread:$0]  (%p1751_p0), %s1649_s6, 128, %s1647_s13, %s803_s14, %s1397_s9, %s1397_s9, %s1398_s29  }
 0x68a   : > { %s1001_s6 = sshll.u32 %s1453_s22, 8  ;;  %s275_s13 = scalar_lea.vmem [#allocation8], %s965_s17 }
 0x68b   : > { %s816_s14 = sshll.u32 %s275_s13, 4  ;;  %s1686_s12 = scalar_lea.hbm %s1734_s4, %s1001_s6  ;;  %s1688_s14 = int_to_ptr.vmem [resolvable:$true] %s816_s14 }
 0x68c   : > { %s798_s28 = scalar_lea.sflag [#allocation4], %s1558_s16  ;;  %s1313_s7 = scalar_lea.vmem %s1688_s14, 256 }
 0x68d   : > { %p1314_p1 = scmp.ne.s32.totalorder %s1688_s14, %s1313_s7  ;;  %s1399_s22 = smov [#allocation8]  }
 0x68e   : > { %s1317_s17 = sshll.u32 %s1399_s22, 4  ;;  %s1318_s17 = int_to_ptr.vmem [resolvable:$false] %s1317_s17 }
 0x68f   : > { %p1315_p2 = pnand %p1314_p1, %p1751_p0  ;;  %s1319_s9 = scalar_lea.vmem %s1318_s17, 512 }
 0x690   : > { %p1320_p11 = scmp.lt.s32.totalorder %s1688_s14, %s1318_s17  ;;  %p1321_p7 = scmp.lt.s32.totalorder %s1319_s9, %s1313_s7 }
 0x691   : > { %p1316_p6 = pneg %p1315_p2 }
 0x692   : > { %p1322_p9 = por %p1321_p7, %p1320_p11 }
 0x694   : > { %p1323_p12 = pnand %p1322_p9, %p1316_p6 }
 0x701   : > { %v769_v49 = vpop.xlane.xlu0 %768 }
 0x702   : > { %v772_v52 = vmul.f32 0.03125, %v769_v49 }
 0x704   : > { %v774_v53 = vadd.f32 1e-05, %v772_v52 }
 0x705   : > { %v771_v54 = vpop.xlane.xlu1 %770 }
 0x706   : > { %1203 = vrsqrt.f32 %v774_v53  ;;  %v773_v55 = vmul.f32 0.03125, %v771_v54 }
 0x708   : > { %v775_v56 = vadd.f32 1e-05, %v773_v55 }
 0x70a   : > { %1205 = vrsqrt.f32 %v775_v56 }
 0x713   : > { %v1204_v57 = vpop.eup %1203 }
 0x714   : > { %v778_v59 = vmul.f32 %v1204_v57, %v764_v46 }
 0x716   : > { %v784_v61 = vmul.f32 %v990_v58, %v778_v59 }
 0x717   : > { %v1206_v62 = vpop.eup %1205 }
 0x718   : > { %v790_v63 = vadd.f32 %v991_v60, %v784_v61  ;;  %v779_v1 = vmul.f32 %v1206_v62, %v765_v50 }
 0x71a   : > { %v785_v2 = vmul.f32 %v990_v58, %v779_v1  ;;  %792 = vst [vmem:[%s275_s13] sm:$0xff] %v790_v63 }
 0x71c   : > { %v791_v3 = vadd.f32 %v991_v60, %v785_v2 }
 0x71e   : > { %793 = vst [vmem:[%s275_s13 + $0x8] sm:$0xff] %v791_v3 }
 0x71f   : > { %1326 = shalt.err (!%p1323_p12)
}
 0x720   : > { %s1327_s29 = scalar_lea.hbm %s1686_s12, 256  ;;  %s1331_s26 = scalar_lea.hbm %s1734_s4, 1024 }
 0x721   : > { %p1328_p3 = scmp.ne.s32.totalorder %s1686_s12, %s1327_s29  ;;  %p1332_p8 = scmp.lt.s32.totalorder %s1686_s12, %s1734_s4 }
 0x722   : > { %p1333_p5 = scmp.lt.s32.totalorder %s1331_s26, %s1327_s29 }
 0x723   : > { %p1329_p13 = pnand %p1328_p3, %p1751_p0 }
 0x724   : > { %p1334_p10 = por %p1333_p5, %p1332_p8 }
 0x725   : > { %p1330_p4 = pneg %p1329_p13 }
 0x727   : > { %p1335_p1 = pnand %p1334_p10, %p1330_p4 }
 0x729   : > { %1338 = shalt.err (!%p1335_p1)
}
 0x72a   : > { %s1400_s13 = smov 128   ;;  %s1401_s10 = smov 8  }
 0x72b   : > { %1103 = dma.vmem_to_hbm [thread:$0]  (%p1751_p0), %s1688_s14, 256, %s1686_s12, %s798_s28, %s1400_s13, %s1400_s13, %s1401_s10  }
 0x72c PF: > { %p1130_p2 = scmp.ge.s32.totalorder %s1385_s21, 2  ;;  %s847_s11 = sand.u32 1, %s1373_s18  }
 0x72d   : > { %p1752_p6 = scmp.ne.s32.totalorder %s1741_s25, 0  ;;  %s848_s7 = scalar_lea.sflag [#allocation4], %s847_s11 }
 0x72f   : > { %p1119_p11 = pnand %p1130_p2, %p1752_p6 }
 0x731   : > { %p1120_p7 = pneg %p1119_p11 }
 0x733   : > { %1364 = dma.done.wait (%p1120_p7), %s848_s7, 256  }
 0x734   : > { %1366 = vsyncadd (%p1120_p7), %s848_s7, 4294967040  ;;  %s857_s22 = scalar_lea.sflag [#allocation10], %s847_s11 }
 0x735   : > { %1368 = dma.done.wait (%p1120_p7), %s857_s22, 128  }
 0x736   : > { %1370 = vsyncadd (%p1120_p7), %s857_s22, 4294967168  ;;  %p23_p0 = scmp.ge.s32.totalorder %s1503_s15, 6   ;;  %s1753_s18 = smov %s1377_s19 }
 0x737   : > { %s1754_s19 = smov %s1381_s20  ;;  %s1755_s20 = smov %s1519_s27 }
 0x738   : > { %s1756_s21 = smov %s1503_s15  ;;  %25 = sbr.rel (!%p23_p0) target bundleno = 8 (0x8), region = 106 }
 0x73d   :  { %862 = vsyncpa [#allocation3], 1 }
 0x73e   :  { %864 = vsyncpa [#allocation3 + $0x1], 1 }
 0x73f   :  { %865 = vsyncpa [#allocation6], 1 }
 0x740   :  { %866 = vsyncpa [#allocation4], 1 }
 0x741   :  { %868 = vsyncpa [#allocation4 + $0x1], 1 }
 0x742   :  { %869 = vsyncpa [#allocation10], 1 }
 0x743   :  { %871 = vsyncpa [#allocation10 + $0x1], 1 }

</bundles_post_ra>
